<compile_context>
chip_gen: v5e
topology: v5e:2x2
jax: 0.10.0
libtpu: 0.0.40
codegen_flags: <defaults>
</compile_context>

<pallas_src>
import jax
import jax.numpy as jnp
from jax.experimental import pallas as pl
from jax.experimental.pallas import tpu as pltpu


# --------------------------------------------------------------------------
# Kernel
# --------------------------------------------------------------------------
def _attention_body(f_tile, g_all, tv_all, t_res, gamma, out_ref):
    """f_tile: (TQ, C8)  g_all: (C8, N)  tv_all: (N, D)  t_res: (TQ, D)."""
    # logits[i, j] = sum_k f[i, k] * g[k, j]   (dominant matmul, contraction C/8)
    logits = jnp.dot(f_tile, g_all, preferred_element_type=jnp.float32)    # (TQ, N)

    # Numerically-stable softmax numerator in f32.  Normalization is deferred
    # until after the PV matmul so it is a (TQ, D) multiply, not (TQ, N).
    logits = logits - jnp.max(logits, axis=-1, keepdims=True)
    e = jnp.exp(logits)                                                    # (TQ, N)
    denom = jnp.sum(e, axis=-1, keepdims=True)                             # (TQ, 1)

    # o = e @ t (unnormalized values), f32 accumulation on the MXU.
    o = jnp.dot(e.astype(tv_all.dtype), tv_all,
                preferred_element_type=jnp.float32)                        # (TQ, D)

    # gamma / rowsum in one go: EUP reciprocal + one small multiply; then the
    # residual add in f32.
    scale = gamma * pl.reciprocal(denom, approx=True)                      # (TQ, 1)
    out_ref[0] = (o * scale + t_res.astype(jnp.float32)).astype(out_ref.dtype)


def _make_kernel(tq, separate_residual):
    if separate_residual:
        def kernel(f_ref, g_ref, tv_ref, tr_ref, gamma_ref, out_ref):
            _attention_body(f_ref[0], g_ref[0], tv_ref[0], tr_ref[0],
                            gamma_ref[0, 0], out_ref)
    else:
        def kernel(f_ref, g_ref, tv_ref, gamma_ref, out_ref):
            # Residual rows are a slice of the resident t block: no second
            # HBM fetch of t per query tile.
            start = pl.multiple_of(pl.program_id(1) * tq, tq)
            t_res = tv_ref[0, pl.ds(start, tq), :]
            _attention_body(f_ref[0], g_ref[0], tv_ref[0], t_res,
                            gamma_ref[0, 0], out_ref)
    return kernel


# --------------------------------------------------------------------------
# Chip-aware tiling / VMEM heuristics
# --------------------------------------------------------------------------
def _vmem_capacity_bytes():
    try:
        return int(pltpu.get_tpu_info().vmem_capacity_bytes)
    except Exception:
        # Non-TPU backend / interpret mode: assume the 128 MiB (v5e/v6e) class.
        return 128 * 1024 * 1024


def _pick_query_tile(n, c8, d, comp, tbytes, vmem_cap):
    """Whole N when small; otherwise the largest aligned divisor that fits."""
    if n <= 1024:
        return n
    residents = 2 * (c8 + d) * n * comp              # g + t values (double-buffered)
    budget = int(0.6 * vmem_cap) - residents
    max_tq = 512
    if vmem_cap <= 64 * 1024 * 1024 and n >= 2048:   # v7x: 64 MiB physical VMEM
        max_tq = 256
    for cand in (512, 256, 128):                     # 256-multiples first (v6e/v7x MXU)
        if cand <= max_tq and n % cand == 0:
            per_tile = 3 * cand * n * 4 + 2 * cand * (c8 * comp + 2 * d * tbytes)
            if per_tile <= budget:
                return cand
    for cand in (128, 64, 32, 16, 8):
        if n % cand == 0:
            return cand
    return n


# --------------------------------------------------------------------------
# Wrapper
# --------------------------------------------------------------------------
def self_attention(x_nchw, t, wf, wg, gamma, *, matmul_dtype=jnp.bfloat16, tq=None):
    """x_nchw: (B, C, W, H); t: (B, N, D); wf/wg: (C//8, C, 1, 1); gamma: (1,)."""
    B, C, W, H = x_nchw.shape
    N = W * H
    D = t.shape[-1]
    C8 = wf.shape[0]

    x_bcn = x_nchw.reshape(B, C, N)
    # 1x1 convs (bias = 0) precomputed in the wrapper in f32, cast once: keeps
    # the kernel's dominant contraction at C/8 and avoids any x duplication.
    f = jnp.einsum("oc,bcn->bno", wf.reshape(C8, C), x_bcn).astype(matmul_dtype)  # (B,N,C8)
    g = jnp.einsum("oc,bcn->bon", wg.reshape(C8, C), x_bcn).astype(matmul_dtype)  # (B,C8,N)
    gamma2 = jnp.reshape(gamma, (1, 1)).astype(jnp.float32)                       # SMEM scalar

    comp = jnp.dtype(matmul_dtype).itemsize
    tbytes = jnp.dtype(t.dtype).itemsize
    vmem_cap = _vmem_capacity_bytes()

    if tq is None:
        tq = _pick_query_tile(N, C8, D, comp, tbytes, vmem_cap)
    assert N % tq == 0, (N, tq)  # TODO(synk): ragged N needs a masked tail tile.
    nq = N // tq

    # If the MXU dtype differs from t's dtype, pass a once-cast value copy
    # (resident) plus the original-dtype residual rows per tile; otherwise t is
    # read exactly once and the residual is sliced from the resident block.
    separate_residual = jnp.dtype(matmul_dtype) != jnp.dtype(t.dtype)
    tv = t.astype(matmul_dtype) if separate_residual else t

    in_specs = [
        pl.BlockSpec((1, tq, C8), lambda b, qi: (b, qi, 0)),   # f: query tile
        pl.BlockSpec((1, C8, N), lambda b, qi: (b, 0, 0)),     # g: resident per batch
        pl.BlockSpec((1, N, D), lambda b, qi: (b, 0, 0)),      # t values: resident
    ]
    args = [f, g, tv]
    if separate_residual:
        in_specs.append(pl.BlockSpec((1, tq, D), lambda b, qi: (b, qi, 0)))  # residual rows
        args.append(t)
    in_specs.append(pl.BlockSpec(memory_space=pltpu.MemorySpace.SMEM))       # gamma
    args.append(gamma2)

    # Rough per-step VMEM working set; only ever *raise* the scoped limit above
    # the generation default (16 MiB v5e / 32 MiB v6e,v7x) and keep >=25%
    # physical headroom.
    working = (2 * tq * C8 * comp + 2 * C8 * N * comp + 2 * N * D * comp
               + (2 * tq * D * tbytes if separate_residual else 0)
               + 2 * tq * D * tbytes + 3 * tq * N * 4)
    vmem_limit = None
    if working > 12 * 1024 * 1024:
        vmem_limit = int(min(max(2 * working, 32 * 1024 * 1024), 0.75 * vmem_cap))

    return pl.pallas_call(
        _make_kernel(tq, separate_residual),
        out_shape=jax.ShapeDtypeStruct((B, N, D), t.dtype),
        grid_spec=pl.GridSpec(
            grid=(B, nq),
            in_specs=in_specs,
            out_specs=pl.BlockSpec((1, tq, D), lambda b, qi: (b, qi, 0)),
        ),
        compiler_params=pltpu.CompilerParams(
            dimension_semantics=("parallel", "parallel"),
            vmem_limit_bytes=vmem_limit,
        ),
    )(*args)


# --------------------------------------------------------------------------
# Reference and test
# --------------------------------------------------------------------------
def reference(x_nchw, t, wf, wg, gamma):
    """Plain-JAX reference mirroring the PyTorch forward (unfused, f32)."""
    B, C, W, H = x_nchw.shape
    N = W * H
    C8 = wf.shape[0]
    xf = x_nchw.reshape(B, C, N)
    f = jnp.einsum("oc,bcn->bon", wf.reshape(C8, C), xf)
    g = jnp.einsum("oc,bcn->bon", wg.reshape(C8, C), xf)
    attn = jnp.einsum("bci,bcj->bij", f, g)
    attn = jax.nn.softmax(attn, axis=-1)
    out = jnp.einsum("bij,bjd->bid", attn, t)
    return gamma * out + t


def xavier_uniform_conv1x1(key, out_ch, in_ch):
    # nn.init.xavier_uniform_ for a (out, in, 1, 1) conv weight.
    bound = (6.0 / (in_ch + out_ch)) ** 0.5
    return jax.random.uniform(
        key, (out_ch, in_ch, 1, 1), minval=-bound, maxval=bound, dtype=jnp.float32
    )


if __name__ == "__main__":
    B, C, W, H = 2, 32, 8, 8      # in_dim = 32 -> f/g project to 32 // 8 = 4
    N = W * H                     # 64
    D = 32                        # feature dim of t

    key = jax.random.PRNGKey(0)
    kx, kt, kf, kg = jax.random.split(key, 4)

    x = jax.random.normal(kx, (B, C, W, H), dtype=jnp.float32)
    t = jax.random.normal(kt, (B, N, D), dtype=jnp.float32)
    wf = xavier_uniform_conv1x1(kf, C // 8, C)
    wg = xavier_uniform_conv1x1(kg, C // 8, C)

    # 1) Faithful to the module's __init__ (gamma = 0): output must equal t.
    gamma0 = jnp.zeros((1,), dtype=jnp.float32)
    out0 = jax.block_until_ready(
        self_attention(x, t, wf, wg, gamma0, matmul_dtype=jnp.float32))
    assert jnp.allclose(out0, t, atol=1e-6, rtol=0.0), "gamma=0 must return t"

    # 2) Nonzero gamma, f32 matmul path (tight tolerance; the only deviation
    #    from the reference is the approximate EUP reciprocal in the softmax
    #    denominator, ~2^-12 relative).
    gamma_nz = jnp.full((1,), 0.37, dtype=jnp.float32)
    ref_nz = reference(x, t, wf, wg, gamma_nz)
    out_f32 = jax.block_until_ready(
        self_attention(x, t, wf, wg, gamma_nz, matmul_dtype=jnp.float32))
    assert jnp.allclose(out_f32, ref_nz, atol=5e-3, rtol=5e-3)

    # 3) Nonzero gamma, bf16 MXU path.  bf16-rounded f/g logits feed an exp(),
    #    so attention weights carry a few-percent relative error by design;
    #    compare with an appropriately loose tolerance.
    out_bf16 = jax.block_until_ready(
        self_attention(x, t, wf, wg, gamma_nz, matmul_dtype=jnp.bfloat16))
    assert jnp.allclose(out_bf16, ref_nz, atol=1e-1, rtol=1e-1)

    print("KERNEL_OK")
</pallas_src>

<mosaic_0001>
module attributes {stable_mosaic.version = 11 : i64} {
  func.func @kernel(%arg0: i32, %arg1: i32, %arg2: memref<1x64x4xf32, #tpu.memory_space<vmem>>, %arg3: memref<1x4x64xf32, #tpu.memory_space<vmem>>, %arg4: memref<1x64x32xf32, #tpu.memory_space<vmem>>, %arg5: memref<1x1xf32, #tpu.memory_space<smem>>, %arg6: memref<1x64x32xf32, #tpu.memory_space<vmem>>) attributes {dimension_semantics = [#tpu.dimension_semantics<parallel>, #tpu.dimension_semantics<parallel>], iteration_bounds = array<i64: 2, 1>, scalar_prefetch = 0 : i64, scratch_operands = 0 : i64, tpu.core_type = #tpu.core_type<tc>, window_params = [{transform_indices = @transform_0, window_bounds = array<i64: 1, 64, 4>}, {transform_indices = @transform_1, window_bounds = array<i64: 1, 4, 64>}, {transform_indices = @transform_2, window_bounds = array<i64: 1, 64, 32>}, {transform_indices = @transform_3, window_bounds = array<i64: 1, 1>}, {transform_indices = @transform_4, window_bounds = array<i64: 1, 64, 32>}]} {
    %c64_i32 = arith.constant 64 : i32
    %0 = arith.muli %arg1, %c64_i32 : i32
    %1 = tpu.assume_multiple %0, 64 : i32
    %c0 = arith.constant 0 : index
    %2 = arith.index_cast %1 : i32 to index
    %c0_0 = arith.constant 0 : index
    %3 = vector.load %arg4[%c0, %2, %c0_0] : memref<1x64x32xf32, #tpu.memory_space<vmem>>, vector<1x64x32xf32>
    %4 = vector.shape_cast %3 : vector<1x64x32xf32> to vector<64x32xf32>
    %c0_1 = arith.constant 0 : index
    %c0_2 = arith.constant 0 : index
    %c0_3 = arith.constant 0 : index
    %5 = vector.load %arg2[%c0_1, %c0_2, %c0_3] : memref<1x64x4xf32, #tpu.memory_space<vmem>>, vector<1x64x4xf32>
    %6 = vector.shape_cast %5 : vector<1x64x4xf32> to vector<64x4xf32>
    %c0_4 = arith.constant 0 : index
    %c0_5 = arith.constant 0 : index
    %c0_6 = arith.constant 0 : index
    %7 = vector.load %arg3[%c0_4, %c0_5, %c0_6] : memref<1x4x64xf32, #tpu.memory_space<vmem>>, vector<1x4x64xf32>
    %8 = vector.shape_cast %7 : vector<1x4x64xf32> to vector<4x64xf32>
    %c0_7 = arith.constant 0 : index
    %c0_8 = arith.constant 0 : index
    %c0_9 = arith.constant 0 : index
    %9 = vector.load %arg4[%c0_7, %c0_8, %c0_9] : memref<1x64x32xf32, #tpu.memory_space<vmem>>, vector<1x64x32xf32>
    %10 = vector.shape_cast %9 : vector<1x64x32xf32> to vector<64x32xf32>
    %c0_10 = arith.constant 0 : index
    %c0_11 = arith.constant 0 : index
    %11 = memref.load %arg5[%c0_10, %c0_11] : memref<1x1xf32, #tpu.memory_space<smem>>
    %cst = arith.constant dense<0.000000e+00> : vector<64x64xf32>
    %12 = tpu.matmul %6, %8, %cst {dimension_numbers = #tpu.dot_dimension_numbers<[1], [0], [0], [1], [0, 0, 1, 1], [], []>} : vector<64x4xf32>, vector<4x64xf32>, vector<64x64xf32> -> vector<64x64xf32>
    %cst_12 = arith.constant dense<0xFF800000> : vector<64xf32>
    %13 = vector.multi_reduction <maximumf>, %12, %cst_12 [1] : vector<64x64xf32> to vector<64xf32>
    %14 = vector.shape_cast %13 : vector<64xf32> to vector<64x1xf32>
    %15 = vector.broadcast %14 : vector<64x1xf32> to vector<64x64xf32>
    %16 = arith.subf %12, %15 : vector<64x64xf32>
    %17 = math.exp %16 : vector<64x64xf32>
    %cst_13 = arith.constant dense<0.000000e+00> : vector<64xf32>
    %18 = vector.multi_reduction <add>, %17, %cst_13 [1] : vector<64x64xf32> to vector<64xf32>
    %19 = vector.shape_cast %18 : vector<64xf32> to vector<64x1xf32>
    %cst_14 = arith.constant dense<0.000000e+00> : vector<64x32xf32>
    %20 = tpu.matmul %17, %10, %cst_14 {dimension_numbers = #tpu.dot_dimension_numbers<[1], [0], [0], [1], [0, 0, 1, 1], [], []>} : vector<64x64xf32>, vector<64x32xf32>, vector<64x32xf32> -> vector<64x32xf32>
    %21 = tpu.reciprocal %19 {approx = true} : vector<64x1xf32> -> vector<64x1xf32>
    %22 = vector.broadcast %11 : f32 to vector<64x1xf32>
    %23 = arith.mulf %22, %21 : vector<64x1xf32>
    %24 = vector.broadcast %23 : vector<64x1xf32> to vector<64x32xf32>
    %25 = arith.mulf %20, %24 : vector<64x32xf32>
    %26 = arith.addf %25, %4 : vector<64x32xf32>
    %c0_15 = arith.constant 0 : index
    %c0_16 = arith.constant 0 : index
    %c0_17 = arith.constant 0 : index
    %27 = vector.load %arg6[%c0_15, %c0_16, %c0_17] : memref<1x64x32xf32, #tpu.memory_space<vmem>>, vector<1x64x32xf32>
    %28 = vector.shape_cast %27 : vector<1x64x32xf32> to vector<64x32xf32>
    %29 = vector.shape_cast %26 : vector<64x32xf32> to vector<1x64x32xf32>
    tpu.vector_store %arg6[%c0_15, %c0_16, %c0_17], %29 {strides = array<i32>} : memref<1x64x32xf32, #tpu.memory_space<vmem>>, vector<1x64x32xf32>,
    return
  }
  func.func @transform_0(%arg0: i32, %arg1: i32) -> (i32, i32, i32) {
    %c0_i32 = arith.constant 0 : i32
    %c0_i32_0 = arith.constant 0 : i32
    return %arg0, %arg1, %c0_i32 : i32, i32, i32
  }
  func.func @transform_1(%arg0: i32, %arg1: i32) -> (i32, i32, i32) {
    %c0_i32 = arith.constant 0 : i32
    %c0_i32_0 = arith.constant 0 : i32
    %c0_i32_1 = arith.constant 0 : i32
    return %arg0, %c0_i32, %c0_i32_0 : i32, i32, i32
  }
  func.func @transform_2(%arg0: i32, %arg1: i32) -> (i32, i32, i32) {
    %c0_i32 = arith.constant 0 : i32
    %c0_i32_0 = arith.constant 0 : i32
    %c0_i32_1 = arith.constant 0 : i32
    return %arg0, %c0_i32, %c0_i32_0 : i32, i32, i32
  }
  func.func @transform_3(%arg0: i32, %arg1: i32) -> (i32, i32) {
    %c0_i32 = arith.constant 0 : i32
    %c0_i32_0 = arith.constant 0 : i32
    %c0_i32_1 = arith.constant 0 : i32
    return %c0_i32, %c0_i32_0 : i32, i32
  }
  func.func @transform_4(%arg0: i32, %arg1: i32) -> (i32, i32, i32) {
    %c0_i32 = arith.constant 0 : i32
    %c0_i32_0 = arith.constant 0 : i32
    return %arg0, %arg1, %c0_i32 : i32, i32, i32
  }
}

</mosaic_0001>

<bundles_post_ra>
// kernel: tpu_custom_call.1
= control target key start
LH: loop header
LB: loop body
LE: loop exit
PB: predicated region body
PF: predicated region fallthrough
CT: control target
= control target key end

     0   :  { %s825_s17 = smov 0   ;;  %s827_s18 = smov 0   ;;  %s993_s0 = inlined_call_operand.vmem [shape: f32[2,64,4], index: 0, kind: input, shape index: {}]   ;;  %s994_s1 = inlined_call_operand.vmem [shape: f32[2,4,64], index: 1, kind: input, shape index: {}]   ;;  %s995_s2 = inlined_call_operand.vmem [shape: f32[2,64,32], index: 2, kind: input, shape index: {}]   ;;  %s996_s3 = inlined_call_operand.<no memory space> [shape: f32[1,1], index: 3, kind: input, shape index: {}]   ;;  %s997_s4 = inlined_call_operand.vmem [shape: f32[2,64,32], index: 4, kind: output, shape index: {}]  }
   0x1   :  { %9 = sst [smem:[#allocation2]] %s996_s3  ;;  %s829_s19 = smov 0  }
   0x2 LB: > { %s27_s3 = sadd.s32 1, %s791_s18  ;;  %p670_p0 = scmp.ge.s32.totalorder %s795_s19, 1  ;;  %s795_s19 = sphi %s829_s19, %s15_s19   ;;  %s791_s18 = sphi %s827_s18, %s999_s18   ;;  %s787_s17 = sphi %s825_s17, %s998_s17  }
   0x3   : > { %p29_p1 = scmp.ge.s32.totalorder %s27_s3, 2  ;;  %p203_p2 = scmp.lt.s32.totalorder %s795_s19, 3 }
   0x5   : > { %s1001_s3 = smov (%p29_p1, %s27_s3), 0  ;;  %p204_p3 = pnand %p670_p0, %p203_p2 }
   0x6   : > { %p247_p4 = scmp.lt.s32.totalorder (!%p204_p3), %s787_s17, 1  ;;  %s302_s5 = sld [smem:[#allocation2]] (!%p204_p3) }
   0x7   : > { %207 = sbr.rel (%p204_p3) target bundleno = 456 (0x1c8), region = 36 }
   0xc   : > { %s1003_s17 = smov (!%p247_p4, %s787_s17), 1  ;;  %vm328_vm0 = vcmask 1043456   ;;  %vm303_vm1 = vcmask 31744   ;;  %vm373_vm2 = vcmask 523264   ;;  %vm544_vm3 = vcmask 261120  }
   0xd   : > { %s843_s20 = sshll.u32 %s1003_s17, 6  ;;  %s673_s21 = sshll.u32 %s1003_s17, 2 }
   0xe   : > { %s254_s24 = scalar_lea.vmem %s993_s0, %s843_s20  ;;  %s259_s27 = scalar_lea.vmem %s994_s1, %s673_s21 }
   0xf   : > { %v293_v0 = vld [vmem:[%s259_s27] sm:$0xf]  ;;  %v290_v2 = vld [vmem:[%s254_s24 + $0x28] sm:$0xff]  ;;  %v291_v4 = vld [vmem:[%s254_s24 + $0x30] sm:$0xff]  ;;  %s867_s30 = scalar_lea.vmem %s995_s2, %s843_s20  ;;  %s958_s8 = scalar_lea.vmem %s997_s4, %s843_s20 }
  0x10   : > { %v285_v1 = vld [vmem:[%s254_s24] sm:$0xff]  ;;  %678 = vmatpush.msk.msra.mxu0 %vm328_vm0, %v293_v0  ;;  %700 = vmatpush.msk.msra.mxu3 %vm328_vm0, %v293_v0  ;;  %v286_v3 = vld [vmem:[%s254_s24 + $0x8] sm:$0xff]  ;;  %v287_v5 = vld [vmem:[%s254_s24 + $0x10] sm:$0xff] }
  0x11   : > { %679 = vmatmul.msk.f32.vlgmr.msra.gmra.mxu0 %vm303_vm1, %v285_v1  ;;  %684 = vmatmul.msk.f32.vlgmr.msra.gmra.mxu3 %vm303_vm1, %v290_v2  ;;  %v292_v6 = vld [vmem:[%s254_s24 + $0x38] sm:$0xff]  ;;  %v289_v8 = vld [vmem:[%s254_s24 + $0x20] sm:$0xff]  ;;  %v876_v16 = vld [vmem:[%s867_s30 + $0x30] sm:$0xff] }
  0x12   : > { %v288_v7 = vld [vmem:[%s254_s24 + $0x18] sm:$0xff]  ;;  %v899_v27 = vld [vmem:[%s867_s30 + $0x28] sm:$0xff]  ;;  %v904_v28 = vld [vmem:[%s867_s30 + $0x20] sm:$0xff] }
  0x13   : > { %v873_v15 = vld [vmem:[%s867_s30 + $0x38] sm:$0xff]  ;;  %v915_v30 = vld [vmem:[%s867_s30 + $0x10] sm:$0xff]  ;;  %v923_v31 = vld [vmem:[%s867_s30 + $0x8] sm:$0xff] }
  0x14   : > { %478 = vmatpush.msra.mxu1 %v873_v15  ;;  %701 = vmatpush.msra.mxu2 %v873_v15  ;;  %v910_v29 = vld [vmem:[%s867_s30 + $0x18] sm:$0xff]  ;;  %v928_v32 = vld [vmem:[%s867_s30] sm:$0xff] }
  0x15   : > { %702 = vmatpush.msrb.mxu3 %v873_v15 }
  0x16   : > { %479 = vmatpush.msra.mxu1 %v876_v16  ;;  %703 = vmatpush.msra.mxu2 %v876_v16 }
  0x17   : > { %704 = vmatpush.msrb.mxu3 %v876_v16 }
  0x18   : > { %480 = vmatpush.msra.mxu1 %v899_v27  ;;  %705 = vmatpush.msra.mxu2 %v899_v27 }
  0x19   : > { %680 = vmatmul.msk.f32.gmra.mxu0 %vm303_vm1, %v286_v3  ;;  %685 = vmatmul.msk.f32.gmra.mxu3 %vm303_vm1, %v291_v4 }
  0x1a   : > { %706 = vmatpush.msrb.mxu3 %v899_v27  ;;  %481 = vmatpush.msra.mxu1 %v904_v28 }
  0x1b   : > { %707 = vmatpush.msra.mxu2 %v904_v28 }
  0x1c   : > { %708 = vmatpush.msrb.mxu3 %v904_v28  ;;  %482 = vmatpush.msra.mxu1 %v910_v29 }
  0x1d   : > { %709 = vmatpush.msra.mxu2 %v910_v29 }
  0x1e   : > { %710 = vmatpush.msrb.mxu3 %v910_v29  ;;  %483 = vmatpush.msra.mxu1 %v915_v30 }
  0x1f   : > { %711 = vmatpush.msra.mxu2 %v915_v30 }
  0x20   : > { %712 = vmatpush.msrb.mxu3 %v915_v30  ;;  %484 = vmatpush.msra.mxu1 %v923_v31 }
  0x21   : > { %681 = vmatmul.msk.f32.gmra.mxu0 %vm303_vm1, %v287_v5  ;;  %686 = vmatmul.msk.f32.gmra.mxu3 %vm303_vm1, %v292_v6 }
  0x22   : > { %713 = vmatpush.msra.mxu2 %v923_v31  ;;  %714 = vmatpush.msrb.mxu3 %v923_v31 }
  0x23   : > { %485 = vmatpush.msra.mxu1 %v928_v32 }
  0x24   : > { %715 = vmatpush.msra.mxu2 %v928_v32  ;;  %716 = vmatpush.msrb.mxu3 %v928_v32 }
  0x29   : > { %682 = vmatmul.msk.f32.gmra.mxu0 %vm303_vm1, %v288_v7 }
  0x31   : > { %683 = vmatmul.msk.f32.gmra.mxu0 %vm303_vm1, %v289_v8 }
  0x8e   : > { %v349_v9 = vpop.f32.mrf.mxu0 }
  0x8f   : > { %v374_v10 = vsel %vm373_vm2, %v349_v9, -inf }
  0x90   : > { %375 = vmax.xlane.f32.xlu1 %v374_v10  ;;  %v519_v10 = vstv %s302_s5 }
  0x94   : > { %v861_v11 = vpop.f32.mrf.mxu3 }
  0x95   : > { %v389_v12 = vsel %vm373_vm2, %v861_v11, -inf }
  0x96   : > { %v352_v13 = vpop.f32.mrf.mxu0 }
  0x97   : > { %v377_v14 = vsel %vm373_vm2, %v352_v13, -inf }
  0x98   : > { %390 = vmax.xlane.f32.xlu1 %v389_v12  ;;  %378 = vmax.xlane.f32.xlu2 %v377_v14 }
  0x9c   : > { %v883_v17 = vpop.f32.mrf.mxu3 }
  0x9d   : > { %v392_v18 = vsel %vm373_vm2, %v883_v17, -inf }
  0x9e   : > { %v355_v19 = vpop.f32.mrf.mxu0 }
  0x9f   : > { %v380_v20 = vsel %vm373_vm2, %v355_v19, -inf }
  0xa0   : > { %393 = vmax.xlane.f32.xlu2 %v392_v18  ;;  %381 = vmax.xlane.f32.xlu1 %v380_v20 }
  0xa4   : > { %v894_v25 = vpop.f32.mrf.mxu3 }
  0xa5   : > { %v395_v26 = vsel %vm373_vm2, %v894_v25, -inf }
  0xa6   : > { %v358_v21 = vpop.f32.mrf.mxu0 }
  0xa7   : > { %v383_v22 = vsel %vm373_vm2, %v358_v21, -inf }
  0xa8   : > { %384 = vmax.xlane.f32.xlu0 %v383_v22 }
  0xae   : > { %v890_v23 = vpop.f32.mrf.mxu0 }
  0xaf   : > { %v386_v24 = vsel %vm373_vm2, %v890_v23, -inf }
  0xb0   : > { %387 = vmax.xlane.f32.xlu0 %v386_v24 }
  0xb8   : > { %396 = vmax.xlane.f32.xlu0 %v395_v26 }
 0x103   : > { %v376_v33 = vpop.xlane.xlu1 %375 }
 0x104   : > { %v398_v34 = vsub.f32 %v349_v9, %v376_v33 }
 0x106   : > { %v406_v35 = vmul.f32 1.442695, %v398_v34 }
 0x108   : > { %741 = vpow2.f32 %v406_v35 }
 0x10b   : > { %v391_v36 = vpop.xlane.xlu1 %390  ;;  %v379_v37 = vpop.xlane.xlu2 %378 }
 0x10c   : > { %v399_v38 = vsub.f32 %v352_v13, %v379_v37  ;;  %v403_v46 = vsub.f32 %v861_v11, %v391_v36 }
 0x10e   : > { %v742_v39 = vpop.eup %741  ;;  %v408_v40 = vmul.f32 1.442695, %v399_v38  ;;  %v416_v48 = vmul.f32 1.442695, %v403_v46 }
 0x10f   : > { %687 = vmatmul.msk.f32.vlgmr.msra.gmra.mxu1 %vm373_vm2, %v742_v39  ;;  %v422_v41 = vsel %vm373_vm2, %v742_v39, 0.0 }
 0x110   : > { %423 = vadd.xlane.f32.xlu2 %v422_v41  ;;  %743 = vpow2.f32 %v408_v40 }
 0x113   : > { %v382_v42 = vpop.xlane.xlu1 %381  ;;  %v394_v49 = vpop.xlane.xlu2 %393 }
 0x114   : > { %v400_v43 = vsub.f32 %v355_v19, %v382_v42  ;;  %v404_v52 = vsub.f32 %v883_v17, %v394_v49 }
 0x116   : > { %v410_v44 = vmul.f32 1.442695, %v400_v43  ;;  %v744_v45 = vpop.eup %743  ;;  %v418_v56 = vmul.f32 1.442695, %v404_v52 }
 0x117   : > { %688 = vmatmul.msk.f32.gmra.mxu1 %vm373_vm2, %v744_v45  ;;  %v425_v47 = vsel %vm373_vm2, %v744_v45, 0.0 }
 0x118   : > { %745 = vpow2.f32 %v410_v44  ;;  %426 = vadd.xlane.f32.xlu0 %v425_v47 }
 0x119   : > { %747 = vpow2.f32 %v416_v48 }
 0x11b   : > { %v385_v50 = vpop.xlane.xlu0 %384 }
 0x11c   : > { %v401_v51 = vsub.f32 %v358_v21, %v385_v50 }
 0x11e   : > { %v412_v53 = vmul.f32 1.442695, %v401_v51  ;;  %v746_v54 = vpop.eup %745 }
 0x11f   : > { %689 = vmatmul.msk.f32.gmra.mxu1 %vm373_vm2, %v746_v54  ;;  %v428_v55 = vsel %vm373_vm2, %v746_v54, 0.0  ;;  %v748_v59 = vpop.eup %747 }
 0x120   : > { %749 = vpow2.f32 %v412_v53  ;;  %429 = vadd.xlane.f32.xlu1 %v428_v55  ;;  %v437_v63 = vsel %vm373_vm2, %v748_v59, 0.0 }
 0x121   : > { %751 = vpow2.f32 %v418_v56 }
 0x123   : > { %v388_v57 = vpop.xlane.xlu0 %387 }
 0x124   : > { %v402_v58 = vsub.f32 %v890_v23, %v388_v57 }
 0x126   : > { %v750_v60 = vpop.eup %749  ;;  %v414_v61 = vmul.f32 1.442695, %v402_v58 }
 0x127   : > { %690 = vmatmul.msk.f32.vlgmr.msra.gmra.mxu2 %vm373_vm2, %v750_v60  ;;  %v431_v62 = vsel %vm373_vm2, %v750_v60, 0.0  ;;  %v752_v1 = vpop.eup %751 }
 0x128   : > { %753 = vpow2.f32 %v414_v61  ;;  %432 = vadd.xlane.f32.xlu2 %v431_v62  ;;  %438 = vadd.xlane.f32.xlu1 %v437_v63  ;;  %v440_v5 = vsel %vm373_vm2, %v752_v1, 0.0 }
 0x12b   : > { %v397_v0 = vpop.xlane.xlu0 %396 }
 0x12c   : > { %v405_v2 = vsub.f32 %v894_v25, %v397_v0 }
 0x12e   : > { %v754_v3 = vpop.eup %753  ;;  %v420_v4 = vmul.f32 1.442695, %v405_v2 }
 0x12f   : > { %691 = vmatmul.msk.f32.gmra.mxu2 %vm373_vm2, %v754_v3  ;;  %v434_v6 = vsel %vm373_vm2, %v754_v3, 0.0 }
 0x130   : > { %755 = vpow2.f32 %v420_v4  ;;  %441 = vadd.xlane.f32.xlu2 %v440_v5  ;;  %435 = vadd.xlane.f32.xlu0 %v434_v6 }
 0x136   : > { %v756_v7 = vpop.eup %755 }
 0x137   : > { %692 = vmatmul.msk.f32.gmra.mxu2 %vm373_vm2, %v748_v59  ;;  %694 = vmatmul.msk.f32.vlgmr.msrb.gmra.mxu3 %vm373_vm2, %v756_v7  ;;  %v443_v8 = vsel %vm373_vm2, %v756_v7, 0.0 }
 0x138   : > { %444 = vadd.xlane.f32.xlu0 %v443_v8 }
 0x13f   : > { %693 = vmatmul.msk.f32.gmra.mxu2 %vm373_vm2, %v752_v1 }
 0x183   : > { %v424_v9 = vpop.xlane.xlu2 %423 }
 0x184   : > { %757 = vrcp.f32 %v424_v9 }
 0x18a   : > { %v758_v11 = vpop.eup %757 }
 0x18b   : > { %v520_v12 = vmul.f32 %v758_v11, %v519_v10  ;;  %v427_v13 = vpop.xlane.xlu0 %426 }
 0x18c   : > { %v487_v14 = vpop.f32.mrf.mxu1  ;;  %759 = vrcp.f32 %v427_v13 }
 0x18d   : > { %v528_v17 = vmul.f32 %v520_v12, %v487_v14 }
 0x18f   : > { %v536_v18 = vadd.f32 %v528_v17, %v928_v32 }
 0x191   : > { %545 = vst.msk [vmem:[%s958_s8] sm:$0xff] %vm544_vm3, %v536_v18 }
 0x192   : > { %v760_v19 = vpop.eup %759 }
 0x193   : > { %v430_v20 = vpop.xlane.xlu1 %429  ;;  %v521_v21 = vmul.f32 %v760_v19, %v519_v10 }
 0x194   : > { %761 = vrcp.f32 %v430_v20  ;;  %v490_v22 = vpop.f32.mrf.mxu1 }
 0x195   : > { %v529_v23 = vmul.f32 %v521_v21, %v490_v22 }
 0x197   : > { %v537_v24 = vadd.f32 %v529_v23, %v923_v31 }
 0x199   : > { %546 = vst.msk [vmem:[%s958_s8 + $0x8] sm:$0xff] %vm544_vm3, %v537_v24 }
 0x19a   : > { %v762_v25 = vpop.eup %761 }
 0x19b   : > { %v522_v26 = vmul.f32 %v762_v25, %v519_v10  ;;  %v433_v33 = vpop.xlane.xlu2 %432  ;;  %v439_v40 = vpop.xlane.xlu1 %438 }
 0x19c   : > { %v493_v34 = vpop.f32.mrf.mxu1  ;;  %763 = vrcp.f32 %v433_v33 }
 0x19d   : > { %v530_v35 = vmul.f32 %v522_v26, %v493_v34 }
 0x19f   : > { %v538_v32 = vadd.f32 %v530_v35, %v915_v30 }
 0x1a1   : > { %547 = vst.msk [vmem:[%s958_s8 + $0x10] sm:$0xff] %vm544_vm3, %v538_v32 }
 0x1a2   : > { %v764_v37 = vpop.eup %763 }
 0x1a3   : > { %v436_v36 = vpop.xlane.xlu0 %435  ;;  %v523_v38 = vmul.f32 %v764_v37, %v519_v10  ;;  %v442_v47 = vpop.xlane.xlu2 %441 }
 0x1a4   : > { %765 = vrcp.f32 %v436_v36 }
 0x1a5   : > { %767 = vrcp.f32 %v439_v40 }
 0x1aa   : > { %v496_v39 = vpop.f32.mrf.mxu2  ;;  %v766_v43 = vpop.eup %765 }
 0x1ab   : > { %v531_v31 = vmul.f32 %v523_v38, %v496_v39  ;;  %v445_v42 = vpop.xlane.xlu0 %444  ;;  %v524_v44 = vmul.f32 %v766_v43, %v519_v10  ;;  %v768_v46 = vpop.eup %767 }
 0x1ac   : > { %769 = vrcp.f32 %v445_v42 }
 0x1ad   : > { %v539_v41 = vadd.f32 %v531_v31, %v910_v29  ;;  %771 = vrcp.f32 %v442_v47  ;;  %v525_v29 = vmul.f32 %v768_v46, %v519_v10 }
 0x1af   : > { %548 = vst.msk [vmem:[%s958_s8 + $0x18] sm:$0xff] %vm544_vm3, %v539_v41 }
 0x1b2   : > { %v499_v30 = vpop.f32.mrf.mxu2  ;;  %v770_v49 = vpop.eup %769 }
 0x1b3   : > { %v532_v45 = vmul.f32 %v524_v44, %v499_v30  ;;  %v527_v50 = vmul.f32 %v770_v49, %v519_v10  ;;  %v772_v57 = vpop.eup %771 }
 0x1b5   : > { %v540_v48 = vadd.f32 %v532_v45, %v904_v28  ;;  %v526_v28 = vmul.f32 %v772_v57, %v519_v10 }
 0x1b7   : > { %549 = vst.msk [vmem:[%s958_s8 + $0x20] sm:$0xff] %vm544_vm3, %v540_v48 }
 0x1ba   : > { %v502_v51 = vpop.f32.mrf.mxu2  ;;  %v508_v52 = vpop.f32.mrf.mxu3 }
 0x1bb   : > { %v533_v53 = vmul.f32 %v525_v29, %v502_v51  ;;  %v535_v54 = vmul.f32 %v527_v50, %v508_v52 }
 0x1bd   : > { %v541_v55 = vadd.f32 %v533_v53, %v899_v27  ;;  %v543_v56 = vadd.f32 %v535_v54, %v873_v15 }
 0x1bf   : > { %550 = vst.msk [vmem:[%s958_s8 + $0x28] sm:$0xff] %vm544_vm3, %v541_v55 }
 0x1c0   : > { %552 = vst.msk [vmem:[%s958_s8 + $0x38] sm:$0xff] %vm544_vm3, %v543_v56 }
 0x1c2   : > { %v505_v58 = vpop.f32.mrf.mxu2 }
 0x1c3   : > { %v534_v59 = vmul.f32 %v526_v28, %v505_v58 }
 0x1c5   : > { %v542_v60 = vadd.f32 %v534_v59, %v876_v16 }
 0x1c7   : > { %551 = vst.msk [vmem:[%s958_s8 + $0x30] sm:$0xff] %vm544_vm3, %v542_v60 }
 0x1c8 PF: > { %s15_s19 = sadd.s32 1, %s795_s19   ;;  %s998_s17 = smov %s791_s18 }
 0x1c9   : > { %p12_p5 = scmp.ge.s32.totalorder %s15_s19, 4   ;;  %s999_s18 = smov %s1001_s3 }
 0x1cb   :  { %14 = sbr.rel (!%p12_p5) target bundleno = 2 (0x2), region = 73 }

</bundles_post_ra>
